<compile_context>
chip_gen: v7x
topology: tpu7x:2x2x1
jax: 0.10.0
libtpu: 0.0.40
codegen_flags: <defaults>
</compile_context>

<pallas_src>
import jax
import jax.numpy as jnp
from jax.experimental import pallas as pl
from jax.experimental.pallas import tpu as pltpu


# ----------------------------- Pallas kernel --------------------------------
def _sac_critic_fused_kernel(xa_ref, w1_ref, b1_ref, w2_ref, b2_ref,
                             w3_ref, b3_ref, out_ref):
    # Single invocation, everything VMEM-resident.  Three matmuls total; all
    # critics are computed at once via lane-fused / block-diagonal weights.
    xa = xa_ref[...]                                            # (B, obs+act)

    h = jnp.dot(xa, w1_ref[...],
                preferred_element_type=jnp.float32) + b1_ref[...]   # (B, Hp)
    h = jnp.maximum(h, 0.0)                                          # ReLU

    h = jnp.dot(h, w2_ref[...],
                preferred_element_type=jnp.float32) + b2_ref[...]   # (B, Hp)
    h = jnp.maximum(h, 0.0)

    # Output layer: (B, Hp) @ (Hp, C) -> single full-block store of all critics.
    out_ref[...] = (jnp.dot(h, w3_ref[...], preferred_element_type=jnp.float32)
                    + b3_ref[...])                                   # (B, C)


# ------------------------- One-time parameter prep ---------------------------
def prepare_params(params, low, high, lane=128):
    """Fold action scaling into layer 1 and fuse all critics' weights.

    Run ONCE whenever the critic parameters change (not per forward call).
    Returns (W1_all, b1_all, W2_all, b2_all, W3_all, b3_all) with the fused
    hidden width padded up to a multiple of `lane` (128) with zero columns.
    """
    w1x, w1a, b1, w2, b2, w3, b3 = params
    C, obs_dim, H = w1x.shape
    act_dim = w1a.shape[1]
    in_dim = obs_dim + act_dim

    # Fold min_max_scaling(a) = (a - low) / (high - low) into layer 1:
    #   a_norm @ W1a == a @ (diag(1/(high-low)) @ W1a) - (low/(high-low)) @ W1a
    rng = high - low                                        # (1, act_dim)
    inv_range = jnp.where(rng == 0, 0.0, 1.0 / rng)         # guard zero-width dims
    w1a_f = w1a * inv_range[0][None, :, None]               # (C, act_dim, H)
    b1_f = b1 - jnp.einsum('oa,cah->coh', low, w1a_f)       # (C, 1, H)

    # Fused (lane-padded) hidden width.
    Hp = ((C * H + lane - 1) // lane) * lane

    W1_all = jnp.zeros((in_dim, Hp), jnp.float32)
    b1_all = jnp.zeros((1, Hp), jnp.float32)
    W2_all = jnp.zeros((Hp, Hp), jnp.float32)       # block-diagonal
    b2_all = jnp.zeros((1, Hp), jnp.float32)
    W3_all = jnp.zeros((Hp, C), jnp.float32)
    for c in range(C):
        s = c * H
        W1_all = W1_all.at[:obs_dim, s:s + H].set(w1x[c])
        W1_all = W1_all.at[obs_dim:, s:s + H].set(w1a_f[c])
        b1_all = b1_all.at[:, s:s + H].set(b1_f[c][0])
        W2_all = W2_all.at[s:s + H, s:s + H].set(w2[c])
        b2_all = b2_all.at[:, s:s + H].set(b2[c][0])
        W3_all = W3_all.at[s:s + H, c:c + 1].set(w3[c])
    b3_all = b3.reshape(1, C).astype(jnp.float32)
    return (W1_all, b1_all, W2_all, b2_all, W3_all, b3_all)


# ------------------------------ Wrapper --------------------------------------
def sac_critic_forward(x, a, fused_params):
    """Returns a list of [B, 1] q-value arrays, one per critic."""
    W1, b1, W2, b2, W3, b3 = fused_params
    num_critics = W3.shape[-1]
    B = x.shape[0]

    # Single combined layer-1 input (action scaling already folded into W1/b1).
    xa = jnp.concatenate([x, a], axis=-1)

    vmem = pl.BlockSpec(memory_space=pltpu.MemorySpace.VMEM)

    out = pl.pallas_call(
        _sac_critic_fused_kernel,
        out_shape=jax.ShapeDtypeStruct((B, num_critics), jnp.float32),
        in_specs=[vmem,   # xa  = concat([x, a])
                  vmem,   # W1_all (obs+act, Hp)   scaling folded, lane-padded
                  vmem,   # b1_all (1, Hp)
                  vmem,   # W2_all (Hp, Hp)        block-diagonal
                  vmem,   # b2_all (1, Hp)
                  vmem,   # W3_all (Hp, C)
                  vmem],  # b3_all (1, C)
        out_specs=vmem,
    )(xa, W1, b1, W2, b2, W3, b3)

    return [out[:, i:i + 1] for i in range(num_critics)]


# --------------------------- Parameter init -----------------------------------
def init_params(key, num_critics, obs_dim, act_dim, hidden):
    """Deterministic torch.nn.Linear-style init: U(-1/sqrt(fan_in), 1/sqrt(fan_in))."""
    def linear(k, fan_in, shape):
        bound = 1.0 / jnp.sqrt(fan_in)
        return jax.random.uniform(k, shape, jnp.float32, -bound, bound)

    ks = jax.random.split(key, 7)
    in1 = obs_dim + act_dim
    w1 = linear(ks[0], in1, (num_critics, in1, hidden))
    w1x, w1a = w1[:, :obs_dim, :], w1[:, obs_dim:, :]
    b1 = linear(ks[1], in1, (num_critics, 1, hidden))
    w2 = linear(ks[2], hidden, (num_critics, hidden, hidden))
    b2 = linear(ks[3], hidden, (num_critics, 1, hidden))
    w3 = linear(ks[4], hidden, (num_critics, hidden, 1))
    b3 = linear(ks[5], hidden, (num_critics, 1, 1))
    return (w1x, w1a, b1, w2, b2, w3, b3)


# ----------------------------- Reference ------------------------------------
def reference_forward(x, a, low, high, params):
    """Pure-JAX reference with the ORIGINAL (unfolded, unfused) parameters."""
    w1x, w1a, b1, w2, b2, w3, b3 = params
    a_norm = (a - low) / (high - low)
    outs = []
    for i in range(w1x.shape[0]):
        h = jnp.concatenate([x, a_norm], axis=-1) @ jnp.concatenate(
            [w1x[i], w1a[i]], axis=0) + b1[i]
        h = jnp.maximum(h, 0.0)
        h = jnp.maximum(h @ w2[i] + b2[i], 0.0)
        outs.append(h @ w3[i] + b3[i])
    return outs


# -------------------------------- Main ---------------------------------------
if __name__ == "__main__":
    B, obs_dim, act_dim, hidden, num_critics = 8, 16, 4, 32, 2

    key = jax.random.PRNGKey(0)
    kx, ka, kp = jax.random.split(key, 3)

    x = jax.random.normal(kx, (B, obs_dim), jnp.float32)              # observations
    # gym.spaces.Box(low=-2, high=2) style action space
    low = jnp.full((1, act_dim), -2.0, jnp.float32)
    high = jnp.full((1, act_dim), 2.0, jnp.float32)
    a = jax.random.uniform(ka, (B, act_dim), jnp.float32, -2.0, 2.0)  # actions

    params = init_params(kp, num_critics, obs_dim, act_dim, hidden)

    # One-time fold + critic fusion (parameter-update-time cost, not per call).
    fused_params = prepare_params(params, low, high)
    fused_params = jax.tree_util.tree_map(jax.block_until_ready, fused_params)

    outs = sac_critic_forward(x, a, fused_params)
    outs = [jax.block_until_ready(o) for o in outs]

    refs = reference_forward(x, a, low, high, params)
    for o, r in zip(outs, refs):
        assert o.shape == (B, 1)
        assert jnp.allclose(o, r, atol=1e-4, rtol=1e-4)

    print("KERNEL_OK")
</pallas_src>

<mosaic_0001>
module attributes {stable_mosaic.version = 11 : i64} {
  func.func @_sac_critic_fused_kernel(%arg0: memref<8x20xf32, #tpu.memory_space<vmem>>, %arg1: memref<20x128xf32, #tpu.memory_space<vmem>>, %arg2: memref<1x128xf32, #tpu.memory_space<vmem>>, %arg3: memref<128x128xf32, #tpu.memory_space<vmem>>, %arg4: memref<1x128xf32, #tpu.memory_space<vmem>>, %arg5: memref<128x2xf32, #tpu.memory_space<vmem>>, %arg6: memref<1x2xf32, #tpu.memory_space<vmem>>, %arg7: memref<8x2xf32, #tpu.memory_space<vmem>>) attributes {dimension_semantics = [], scalar_prefetch = 0 : i64, scratch_operands = 0 : i64, tpu.core_type = #tpu.core_type<tc>} {
    %c0 = arith.constant 0 : index
    %c0_0 = arith.constant 0 : index
    %0 = vector.load %arg0[%c0, %c0_0] : memref<8x20xf32, #tpu.memory_space<vmem>>, vector<8x20xf32>
    %c0_1 = arith.constant 0 : index
    %c0_2 = arith.constant 0 : index
    %1 = vector.load %arg1[%c0_1, %c0_2] : memref<20x128xf32, #tpu.memory_space<vmem>>, vector<20x128xf32>
    %cst = arith.constant dense<0.000000e+00> : vector<8x128xf32>
    %2 = tpu.matmul %0, %1, %cst {dimension_numbers = #tpu.dot_dimension_numbers<[1], [0], [0], [1], [0, 0, 1, 1], [], []>} : vector<8x20xf32>, vector<20x128xf32>, vector<8x128xf32> -> vector<8x128xf32>
    %c0_3 = arith.constant 0 : index
    %c0_4 = arith.constant 0 : index
    %3 = vector.load %arg2[%c0_3, %c0_4] : memref<1x128xf32, #tpu.memory_space<vmem>>, vector<1x128xf32>
    %4 = vector.broadcast %3 : vector<1x128xf32> to vector<8x128xf32>
    %5 = arith.addf %2, %4 : vector<8x128xf32>
    %cst_5 = arith.constant 0.000000e+00 : f32
    %6 = vector.broadcast %cst_5 : f32 to vector<8x128xf32>
    %7 = arith.maximumf %5, %6 : vector<8x128xf32>
    %c0_6 = arith.constant 0 : index
    %c0_7 = arith.constant 0 : index
    %8 = vector.load %arg3[%c0_6, %c0_7] : memref<128x128xf32, #tpu.memory_space<vmem>>, vector<128x128xf32>
    %cst_8 = arith.constant dense<0.000000e+00> : vector<8x128xf32>
    %9 = tpu.matmul %7, %8, %cst_8 {dimension_numbers = #tpu.dot_dimension_numbers<[1], [0], [0], [1], [0, 0, 1, 1], [], []>} : vector<8x128xf32>, vector<128x128xf32>, vector<8x128xf32> -> vector<8x128xf32>
    %c0_9 = arith.constant 0 : index
    %c0_10 = arith.constant 0 : index
    %10 = vector.load %arg4[%c0_9, %c0_10] : memref<1x128xf32, #tpu.memory_space<vmem>>, vector<1x128xf32>
    %11 = vector.broadcast %10 : vector<1x128xf32> to vector<8x128xf32>
    %12 = arith.addf %9, %11 : vector<8x128xf32>
    %cst_11 = arith.constant 0.000000e+00 : f32
    %13 = vector.broadcast %cst_11 : f32 to vector<8x128xf32>
    %14 = arith.maximumf %12, %13 : vector<8x128xf32>
    %c0_12 = arith.constant 0 : index
    %c0_13 = arith.constant 0 : index
    %15 = vector.load %arg5[%c0_12, %c0_13] : memref<128x2xf32, #tpu.memory_space<vmem>>, vector<128x2xf32>
    %cst_14 = arith.constant dense<0.000000e+00> : vector<8x2xf32>
    %16 = tpu.matmul %14, %15, %cst_14 {dimension_numbers = #tpu.dot_dimension_numbers<[1], [0], [0], [1], [0, 0, 1, 1], [], []>} : vector<8x128xf32>, vector<128x2xf32>, vector<8x2xf32> -> vector<8x2xf32>
    %c0_15 = arith.constant 0 : index
    %c0_16 = arith.constant 0 : index
    %17 = vector.load %arg6[%c0_15, %c0_16] : memref<1x2xf32, #tpu.memory_space<vmem>>, vector<1x2xf32>
    %18 = vector.broadcast %17 : vector<1x2xf32> to vector<8x2xf32>
    %19 = arith.addf %16, %18 : vector<8x2xf32>
    %c0_17 = arith.constant 0 : index
    %c0_18 = arith.constant 0 : index
    %20 = vector.load %arg7[%c0_17, %c0_18] : memref<8x2xf32, #tpu.memory_space<vmem>>, vector<8x2xf32>
    tpu.vector_store %arg7[%c0_17, %c0_18], %19 {strides = array<i32>} : memref<8x2xf32, #tpu.memory_space<vmem>>, vector<8x2xf32>,
    return
  }
}

</mosaic_0001>

<bundles_post_ra>
// kernel: tpu_custom_call.1
= control target key start
LH: loop header
LB: loop body
LE: loop exit
PB: predicated region body
PF: predicated region fallthrough
CT: control target
= control target key end

     0   :  { %12 = vsyncpa [#allocation3], 0  ;;  %s527_s24 = smov [#allocation2]   ;;  %s716_s0 = inlined_call_operand.vmem [shape: f32[8,20], index: 0, kind: input, shape index: {}]   ;;  %s717_s1 = inlined_call_operand.hbm [shape: f32[20,128], index: 1, kind: input, shape index: {}]   ;;  %s718_s2 = inlined_call_operand.vmem [shape: f32[1,128], index: 2, kind: input, shape index: {}]   ;;  %s719_s3 = inlined_call_operand.vmem [shape: f32[128,128], index: 3, kind: input, shape index: {}]   ;;  %s720_s4 = inlined_call_operand.vmem [shape: f32[1,128], index: 4, kind: input, shape index: {}]   ;;  %s721_s5 = inlined_call_operand.vmem [shape: f32[128,2], index: 5, kind: input, shape index: {}]   ;;  %s722_s6 = inlined_call_operand.vmem [shape: f32[1,2], index: 6, kind: input, shape index: {}]   ;;  %s723_s7 = inlined_call_operand.vmem [shape: f32[8,2], index: 7, kind: output, shape index: {}]  }
   0x1   :  { %s20_s25 = sshll.u32 %s527_s24, 4  ;;  %s503_s28 = scalar_lea.hbm %s717_s1, 384  ;;  %s21_s25 = int_to_ptr.vmem [resolvable:$true] %s20_s25 }
   0x2   :  { %p504_p0 = scmp.ne.s32.totalorder %s717_s1, %s503_s28  ;;  %p507_p1 = scmp.lt.u32.totalorder %s503_s28, %s717_s1 }
   0x4   :  { %p509_p2 = pnand %p507_p1, %p504_p0 }
   0x6   :  { %512 = shalt.err (!%p509_p2)
}
   0x7   :  { %s513_s10 = scalar_lea.vmem %s21_s25, 384  ;;  %p518_p4 = scmp.lt.s32.totalorder %s21_s25, %s21_s25 }
   0x8   :  { %p514_p3 = scmp.ne.s32.totalorder %s21_s25, %s513_s10  ;;  %p519_p5 = scmp.lt.s32.totalorder %s513_s10, %s513_s10 }
   0xa   :  { %p520_p6 = por %p519_p5, %p518_p4 }
   0xc   :  { %p521_p7 = pnand %p520_p6, %p514_p3 }
   0xe   :  { %524 = shalt.err (!%p521_p7)
}
   0xf   :  { %s528_s11 = smov 128   ;;  %s529_s12 = smov 8  }
  0x10   :  { %26 = dma.hbm_to_vmem [thread:$0]  %s717_s1, 384, %s21_s25, [#allocation3], %s528_s11, %s528_s11, %s529_s12  }
  0x11   :  { %525 = dma.done.wait [#allocation3], 384  }
  0x12   :  { %526 = vsyncadd [#allocation3], 4294966912  ;;  %v530_v0 = vmov 0.0|0.0   ;;  %vm531_vm0 = vmmov 0   ;;  %v532_v1 = vmov 0.0   ;;  %v41_v2 = vld [vmem:[#allocation2] sm:$0xff] }
  0x13   :  { %446 = vmatprep.subr.bf16.mxu0 %v530_v0  ;;  %373 = vmatprep.mubr.msk.f32.mxu0 %vm531_vm0, %v532_v1  ;;  %v42_v3 = vld [vmem:[#allocation2 + $0x8] sm:$0xff]  ;;  %v130_v5 = vld [vmem:[%s719_s3] sm:$0xff]  ;;  %v132_v8 = vld [vmem:[%s719_s3 + $0x10] sm:$0xff]  ;;  %vm55_vm1 = vcmask 1043456   ;;  %vm51_vm2 = vcmask 162816   ;;  %vm317_vm3 = vcmask 15360  }
  0x14   :  { %449 = vmatprep.subr.bf16.mxu1 %v530_v0  ;;  %408 = vmatprep.mubr.msk.f32.mxu1 %vm531_vm0, %v532_v1  ;;  %v447_v4 = vpack.c.bf16 %v42_v3, %v41_v2  ;;  %v131_v6 = vld [vmem:[%s719_s3 + $0x8] sm:$0xff]  ;;  %v133_v9 = vld [vmem:[%s719_s3 + $0x18] sm:$0xff]  ;;  %v43_v10 = vld [vmem:[#allocation2 + $0x10] sm:$0xf] }
  0x15   :  { %v450_v7 = vpack.c.bf16 %v131_v6, %v130_v5  ;;  %v453_v11 = vpack.c.bf16 %v133_v9, %v132_v8  ;;  %v40_v12 = vld [vmem:[%s716_s0] sm:$0xff]  ;;  %v135_v14 = vld [vmem:[%s719_s3 + $0x28] sm:$0xff]  ;;  %v136_v16 = vld [vmem:[%s719_s3 + $0x30] sm:$0xff] }
  0x16   :  { %448 = vmatpush3.bf16.msra.mxu0 %v447_v4  ;;  %v134_v13 = vld [vmem:[%s719_s3 + $0x20] sm:$0xff]  ;;  %v137_v17 = vld [vmem:[%s719_s3 + $0x38] sm:$0xff]  ;;  %v139_v20 = vld [vmem:[%s719_s3 + $0x48] sm:$0xff] }
  0x17   :  { %371 = vmatprep.subr.mxu0 %v532_v1  ;;  %451 = vmatpush3.bf16.msra.mxu1 %v450_v7  ;;  %v456_v15 = vpack.c.bf16 %v135_v14, %v134_v13  ;;  %v459_v18 = vpack.c.bf16 %v137_v17, %v136_v16  ;;  %v138_v19 = vld [vmem:[%s719_s3 + $0x40] sm:$0xff]  ;;  %v140_v22 = vld [vmem:[%s719_s3 + $0x50] sm:$0xff]  ;;  %v141_v23 = vld [vmem:[%s719_s3 + $0x58] sm:$0xff] }
  0x18   :  { %452 = vmatprep.subr.bf16.mxu1 %v530_v0  ;;  %v462_v21 = vpack.c.bf16 %v139_v20, %v138_v19  ;;  %v465_v24 = vpack.c.bf16 %v141_v23, %v140_v22  ;;  %v142_v25 = vld [vmem:[%s719_s3 + $0x60] sm:$0xff]  ;;  %v143_v26 = vld [vmem:[%s719_s3 + $0x68] sm:$0xff]  ;;  %v144_v28 = vld [vmem:[%s719_s3 + $0x70] sm:$0xff] }
  0x19   :  { %v468_v27 = vpack.c.bf16 %v143_v26, %v142_v25  ;;  %v145_v29 = vld [vmem:[%s719_s3 + $0x78] sm:$0xff]  ;;  %v224_v31 = vld [vmem:[%s721_s5] sm:$0xff]  ;;  %v225_v32 = vld [vmem:[%s721_s5 + $0x8] sm:$0xff] }
  0x1a   :  { %372 = vmatpush3.msk.msra.mxu0 %vm55_vm1, %v43_v10  ;;  %v471_v30 = vpack.c.bf16 %v145_v29, %v144_v28  ;;  %v226_v33 = vld [vmem:[%s721_s5 + $0x10] sm:$0xff]  ;;  %v474_v34 = vpack.c.bf16 %v225_v32, %v224_v31  ;;  %v227_v35 = vld [vmem:[%s721_s5 + $0x18] sm:$0xff]  ;;  %v228_v37 = vld [vmem:[%s721_s5 + $0x20] sm:$0xff] }
  0x1b   :  { %374 = vmatmul.mubr.msk.f32.vlgmr.msra.gmra.mrb[0].mxu0 %vm51_vm2, %v40_v12  ;;  %454 = vmatpush3.bf16.msra.mxu1 %v453_v11  ;;  %v477_v36 = vpack.c.bf16 %v227_v35, %v226_v33  ;;  %v229_v38 = vld [vmem:[%s721_s5 + $0x28] sm:$0xff]  ;;  %v230_v40 = vld [vmem:[%s721_s5 + $0x30] sm:$0xff]  ;;  %v231_v41 = vld [vmem:[%s721_s5 + $0x38] sm:$0xff] }
  0x1c   :  { %455 = vmatprep.subr.bf16.mxu1 %v530_v0  ;;  %473 = vmatprep.subr.bf16.mxu0 %v530_v0  ;;  %v480_v39 = vpack.c.bf16 %v229_v38, %v228_v37  ;;  %v483_v42 = vpack.c.bf16 %v231_v41, %v230_v40  ;;  %v232_v43 = vld [vmem:[%s721_s5 + $0x40] sm:$0xff]  ;;  %v233_v44 = vld [vmem:[%s721_s5 + $0x48] sm:$0xff]  ;;  %v234_v46 = vld [vmem:[%s721_s5 + $0x50] sm:$0xff] }
  0x1d   :  { %443 = vmatprep.mubr.msk.f32.mxu0 %vm531_vm0, %v532_v1  ;;  %475 = vmatpush3.bf16.msra.mxu0 %v474_v34  ;;  %v486_v45 = vpack.c.bf16 %v233_v44, %v232_v43  ;;  %v235_v47 = vld [vmem:[%s721_s5 + $0x58] sm:$0xff]  ;;  %v236_v49 = vld [vmem:[%s721_s5 + $0x60] sm:$0xff]  ;;  %v237_v50 = vld [vmem:[%s721_s5 + $0x68] sm:$0xff] }
  0x1e   :  { %476 = vmatprep.subr.bf16.mxu0 %v530_v0  ;;  %v489_v48 = vpack.c.bf16 %v235_v47, %v234_v46  ;;  %v492_v51 = vpack.c.bf16 %v237_v50, %v236_v49  ;;  %v324_v52 = vld [vmem:[%s718_s2] ss:$0 sm:$0xff]  ;;  %v238_v57 = vld [vmem:[%s721_s5 + $0x70] sm:$0xff]  ;;  %v239_v58 = vld [vmem:[%s721_s5 + $0x78] sm:$0xff] }
  0x1f   :  { %457 = vmatpush3.bf16.msra.mxu1 %v456_v15  ;;  %v495_v59 = vpack.c.bf16 %v239_v58, %v238_v57  ;;  %v327_v60 = vld [vmem:[%s720_s4] ss:$0 sm:$0xff] }
  0x20   :  { %458 = vmatprep.subr.bf16.mxu1 %v530_v0  ;;  %v328_v1 = vld [vmem:[%s722_s6] ss:$0 sm:$0xff] }
  0x21   :  { %478 = vmatpush3.bf16.msra.mxu0 %v477_v36 }
  0x22   :  { %479 = vmatprep.subr.bf16.mxu0 %v530_v0 }
  0x23   :  { %460 = vmatpush3.bf16.msra.mxu1 %v459_v18 }
  0x24   :  { %461 = vmatprep.subr.bf16.mxu1 %v530_v0 }
  0x25   :  { %481 = vmatpush3.bf16.msra.mxu0 %v480_v39 }
  0x26   :  { %482 = vmatprep.subr.bf16.mxu0 %v530_v0 }
  0x27   :  { %463 = vmatpush3.bf16.msra.mxu1 %v462_v21 }
  0x28   :  { %464 = vmatprep.subr.bf16.mxu1 %v530_v0 }
  0x29   :  { %484 = vmatpush3.bf16.msra.mxu0 %v483_v42 }
  0x2a   :  { %485 = vmatprep.subr.bf16.mxu0 %v530_v0 }
  0x2b   :  { %466 = vmatpush3.bf16.msra.mxu1 %v465_v24 }
  0x2c   :  { %467 = vmatprep.subr.bf16.mxu1 %v530_v0 }
  0x2d   :  { %487 = vmatpush3.bf16.msra.mxu0 %v486_v45 }
  0x2e   :  { %488 = vmatprep.subr.bf16.mxu0 %v530_v0 }
  0x2f   :  { %469 = vmatpush3.bf16.msra.mxu1 %v468_v27 }
  0x30   :  { %470 = vmatprep.subr.bf16.mxu1 %v530_v0 }
  0x31   :  { %490 = vmatpush3.bf16.msra.mxu0 %v489_v48 }
  0x32   :  { %491 = vmatprep.subr.bf16.mxu0 %v530_v0 }
  0x33   :  { %472 = vmatpush3.bf16.msra.mxu1 %v471_v30 }
  0x35   :  { %493 = vmatpush3.bf16.msra.mxu0 %v492_v51 }
  0x36   :  { %494 = vmatprep.subr.bf16.mxu0 %v530_v0 }
  0x39   :  { %496 = vmatpush3.bf16.msra.mxu0 %v495_v59 }
  0xee   :  { %v125_v53 = vpop.f32.mrb[0].mxu0 }
  0xef   :  { %v126_v54 = vadd.f32 %v324_v52, %v125_v53  ;;  %v375_v55 = vpop.f32.mrb[1].mxu0 }
  0xf1   :  { %v129_v56 = vmax.f32 %v126_v54, 0.0 }
  0xf3   :  { %409 = vmatmul.mubr.f32.vlgmr.msra.gmra.mrb[0].mxu1 %v129_v56 }
 0x1c6   :  { %v219_v61 = vpop.f32.mrb[0].mxu1 }
 0x1c7   :  { %v220_v62 = vadd.f32 %v327_v60, %v219_v61  ;;  %v410_v63 = vpop.f32.mrb[1].mxu1 }
 0x1c9   :  { %v223_v0 = vmax.f32 %v220_v62, 0.0 }
 0x1cb   :  { %444 = vmatmul.mubr.f32.vlgmr.msra.gmra.mrb[2].mxu0 %v223_v0 }
 0x29e   :  { %v313_v2 = vpop.f32.mrb[2].mxu0 }
 0x29f   :  { %v314_v3 = vadd.f32 %v328_v1, %v313_v2  ;;  %v445_v4 = vpop.f32.mrb[3].mxu0 }
 0x2a1   :  { %318 = vst.msk [vmem:[%s723_s7] sm:$0xff] %vm317_vm3, %v314_v3 }
 0x2a2   :  { %323 = vsyncpa [#allocation3], 1 }

</bundles_post_ra>
